<compile_context>
chip_gen: v7x
topology: tpu7x:2x2x1
jax: 0.10.0
libtpu: 0.0.40
codegen_flags: <defaults>
</compile_context>

<pallas_src>
import jax
import jax.numpy as jnp
from jax.experimental import pallas as pl
from jax.experimental.pallas import tpu as pltpu


def _round_up(n, m):
    return ((n + m - 1) // m) * m


def _num_tensorcores():
    """Best-effort TensorCore count per chip (2 on v7x-class, else 1)."""
    try:
        info = pltpu.get_tpu_info()
        for attr in ("num_cores", "core_count", "num_tensorcores",
                     "tensorcores_per_chip"):
            n = getattr(info, attr, None)
            if isinstance(n, int) and n > 0:
                return n
    except Exception:
        pass
    try:
        kind = jax.devices()[0].device_kind.lower()
        if "v7" in kind:
            return 2
    except Exception:
        pass
    return 1


def _choose_block_m(batch, num_cores, cap=4096):
    """Batch tile: big tiles amortize the ~0.35us/grid-step pipeline overhead.
    1-TC chips (v5e/v6e): single tile up to the cap. 2-TC chips (v7x): keep the
    grid length a multiple of the core count so both cores get equal work."""
    bp = _round_up(max(batch, 1), 8)
    cores = num_cores if (num_cores >= 2 and bp >= 512) else 1
    n_tiles = max(cores, pl.cdiv(bp, cap))
    if cores >= 2:
        n_tiles = _round_up(n_tiles, cores)
    return min(bp, _round_up(pl.cdiv(bp, n_tiles), 8))


def prepare_params(params, compute_dtype=jnp.bfloat16):
    """One-time parameter prep (hoisted out of the per-call wrapper).

    params: list of 6 (W [in, out], b [1, out]) pairs (W transposed vs torch).
    Pads every feature dim except the input dim to a multiple of 128, casts the
    weights to the compute dtype, and packs biases into one f32 array.
    """
    dims = [params[0][0].shape[0]] + [w.shape[1] for (w, _) in params]
    pdims = [dims[0]] + [_round_up(d, 128) for d in dims[1:]]
    max_n = max(pdims[1:])

    ws = []
    bias = jnp.zeros((len(params), max_n), jnp.float32)
    for i, (w, b) in enumerate(params):
        fi, fo = w.shape
        w_p = jnp.pad(w, ((0, pdims[i] - fi), (0, pdims[i + 1] - fo)))
        ws.append(w_p.astype(compute_dtype))
        bias = bias.at[i, :fo].set(jnp.reshape(b, (-1,)).astype(jnp.float32))
    return {"weights": tuple(ws), "bias": bias,
            "dims": tuple(dims), "pdims": tuple(pdims)}


def _make_kernel(num_layers):
    def kernel(x_ref, *refs):
        w_refs = refs[:num_layers]
        bias_ref = refs[num_layers]
        out_ref = refs[num_layers + 1]
        compute_dtype = w_refs[0].dtype

        # Cast the input tile in-kernel (no wrapper-side pad/cast of x).
        h = x_ref[...].astype(compute_dtype)
        y = h
        for i, w_ref in enumerate(w_refs):
            n = w_ref.shape[1]
            # MXU matmul in the compute dtype with f32 accumulation.
            y = jnp.dot(h, w_ref[...], preferred_element_type=jnp.float32)
            y = y + bias_ref[i:i + 1, :n]          # f32 bias add
            if i != num_layers - 1:
                y = jnp.maximum(y, 0.0)            # ReLU (Dropout = identity)
                h = y.astype(compute_dtype)
        out_ref[...] = y.astype(out_ref.dtype)
    return kernel


def autoencoder_forward(x, prepared, *, block_m=None, out_dtype=None):
    """x: [B, input_dim] f32. prepared: output of prepare_params."""
    ws = prepared["weights"]
    bias = prepared["bias"]
    dims = prepared["dims"]
    pdims = prepared["pdims"]

    B, input_dim = x.shape
    assert input_dim == dims[0], (input_dim, dims[0])
    out_features, out_pad = dims[-1], pdims[-1]
    compute_dtype = ws[0].dtype
    out_dtype = compute_dtype if out_dtype is None else out_dtype

    if block_m is None:
        block_m = _choose_block_m(B, _num_tensorcores())
    block_m = max(8, _round_up(min(block_m, _round_up(B, 8)), 8))
    grid = (pl.cdiv(B, block_m),)

    x_spec = pl.BlockSpec((block_m, input_dim), lambda i: (i, 0))
    w_specs = [pl.BlockSpec(w.shape, lambda i: (0, 0)) for w in ws]
    bias_spec = pl.BlockSpec(bias.shape, lambda i: (0, 0))
    out_spec = pl.BlockSpec((block_m, out_pad), lambda i: (i, 0))

    itemsize = lambda dt: jnp.dtype(dt).itemsize
    w_bytes = sum(w.size * itemsize(w.dtype) for w in ws) + bias.size * 4
    max_w = max(pdims[1:])
    # Rough VMEM budget: double-buffered in/out tiles + resident weights +
    # generous allowance for f32 intermediates; capped at 64 MiB (v7x physical).
    est = (2 * block_m * input_dim * itemsize(x.dtype)
           + 2 * block_m * out_pad * itemsize(out_dtype)
           + 2 * w_bytes
           + 6 * block_m * max_w * 4)
    vmem_limit = int(min(64 << 20, max(32 << 20, _round_up(est, 1 << 20))))

    flops = 2 * B * sum(int(w.shape[0]) * int(w.shape[1]) for w in ws)
    bytes_accessed = int(B * input_dim * itemsize(x.dtype)
                         + B * out_pad * itemsize(out_dtype) + w_bytes)

    out_padded = pl.pallas_call(
        _make_kernel(len(ws)),
        out_shape=jax.ShapeDtypeStruct((B, out_pad), out_dtype),
        grid_spec=pl.GridSpec(
            grid=grid,
            in_specs=[x_spec] + w_specs + [bias_spec],
            out_specs=out_spec,
        ),
        compiler_params=pltpu.CompilerParams(
            dimension_semantics=("parallel",),
            vmem_limit_bytes=vmem_limit),
        cost_estimate=pl.CostEstimate(
            flops=flops, transcendentals=0, bytes_accessed=bytes_accessed),
    )(x, *ws, bias)

    return out_padded[:, :out_features]


def init_params(key, input_dim, hidden_dim1=256, hidden_dim2=128, latent_dim=64):
    """Deterministic init. Weights stored as [in, out]; biases as [1, out]."""
    layer_dims = [
        (input_dim, hidden_dim1),    # encoder L1
        (hidden_dim1, hidden_dim2),  # encoder L2
        (hidden_dim2, latent_dim),   # encoder L3
        (latent_dim, hidden_dim2),   # decoder L1
        (hidden_dim2, hidden_dim1),  # decoder L2
        (hidden_dim1, input_dim),    # decoder L3
    ]
    params = []
    for (fan_in, fan_out) in layer_dims:
        key, kw, kb = jax.random.split(key, 3)
        bound = 1.0 / jnp.sqrt(fan_in)  # matches torch.nn.Linear default init
        w = jax.random.uniform(kw, (fan_in, fan_out), jnp.float32, -bound, bound)
        b = jax.random.uniform(kb, (1, fan_out), jnp.float32, -bound, bound)
        params.append((w, b))
    return params


def reference_forward(x, params):
    h = x
    for i, (w, b) in enumerate(params):
        h = h @ w + b
        if i != len(params) - 1:
            h = jnp.maximum(h, 0.0)
    return h


if __name__ == "__main__":
    key = jax.random.PRNGKey(0)
    k_x, k_p = jax.random.split(key)

    batch, input_dim = 8, 32
    x = jax.random.normal(k_x, (batch, input_dim), jnp.float32)
    params = init_params(k_p, input_dim)
    ref = reference_forward(x, params)

    # f32 compute path: strict numerical check against the pure-JAX reference.
    prep_f32 = prepare_params(params, compute_dtype=jnp.float32)
    out_f32 = jax.block_until_ready(
        autoencoder_forward(x, prep_f32, out_dtype=jnp.float32))
    assert out_f32.shape == (batch, input_dim)
    assert jnp.allclose(out_f32, ref, atol=1e-4, rtol=1e-4)

    # bf16 compute path (default, MXU-friendly): loose numerical check.
    prep_bf16 = prepare_params(params, compute_dtype=jnp.bfloat16)
    out_bf16 = jax.block_until_ready(autoencoder_forward(x, prep_bf16))
    assert out_bf16.shape == (batch, input_dim)
    out_bf16_f32 = out_bf16.astype(jnp.float32)
    assert bool(jnp.all(jnp.isfinite(out_bf16_f32)))
    assert jnp.allclose(out_bf16_f32, ref, atol=1.5e-1, rtol=1.5e-1)

    print("KERNEL_OK")
</pallas_src>

<mosaic_0001>
module attributes {stable_mosaic.version = 11 : i64} {
  func.func @kernel(%arg0: i32, %arg1: memref<8x32xf32, #tpu.memory_space<vmem>>, %arg2: memref<32x256xf32, #tpu.memory_space<vmem>>, %arg3: memref<256x128xf32, #tpu.memory_space<vmem>>, %arg4: memref<128x128xf32, #tpu.memory_space<vmem>>, %arg5: memref<128x128xf32, #tpu.memory_space<vmem>>, %arg6: memref<128x256xf32, #tpu.memory_space<vmem>>, %arg7: memref<256x128xf32, #tpu.memory_space<vmem>>, %arg8: memref<6x256xf32, #tpu.memory_space<vmem>>, %arg9: memref<8x128xf32, #tpu.memory_space<vmem>>) attributes {dimension_semantics = [#tpu.dimension_semantics<parallel>], iteration_bounds = array<i64: 1>, scalar_prefetch = 0 : i64, scratch_operands = 0 : i64, tpu.core_type = #tpu.core_type<tc>, window_params = [{transform_indices = @transform_0, window_bounds = array<i64: 8, 32>}, {pipeline_mode = #tpu.pipeline_mode<synchronous>, transform_indices = @transform_1, window_bounds = array<i64: 32, 256>}, {pipeline_mode = #tpu.pipeline_mode<synchronous>, transform_indices = @transform_2, window_bounds = array<i64: 256, 128>}, {pipeline_mode = #tpu.pipeline_mode<synchronous>, transform_indices = @transform_3, window_bounds = array<i64: 128, 128>}, {pipeline_mode = #tpu.pipeline_mode<synchronous>, transform_indices = @transform_4, window_bounds = array<i64: 128, 128>}, {pipeline_mode = #tpu.pipeline_mode<synchronous>, transform_indices = @transform_5, window_bounds = array<i64: 128, 256>}, {pipeline_mode = #tpu.pipeline_mode<synchronous>, transform_indices = @transform_6, window_bounds = array<i64: 256, 128>}, {pipeline_mode = #tpu.pipeline_mode<synchronous>, transform_indices = @transform_7, window_bounds = array<i64: 6, 256>}, {transform_indices = @transform_8, window_bounds = array<i64: 8, 128>}]} {
    %c0 = arith.constant 0 : index
    %c0_0 = arith.constant 0 : index
    %0 = vector.load %arg1[%c0, %c0_0] : memref<8x32xf32, #tpu.memory_space<vmem>>, vector<8x32xf32>
    %c0_1 = arith.constant 0 : index
    %c0_2 = arith.constant 0 : index
    %1 = vector.load %arg2[%c0_1, %c0_2] : memref<32x256xf32, #tpu.memory_space<vmem>>, vector<32x256xf32>
    %cst = arith.constant dense<0.000000e+00> : vector<8x256xf32>
    %2 = tpu.matmul %0, %1, %cst {dimension_numbers = #tpu.dot_dimension_numbers<[1], [0], [0], [1], [0, 0, 1, 1], [], []>} : vector<8x32xf32>, vector<32x256xf32>, vector<8x256xf32> -> vector<8x256xf32>
    %c0_3 = arith.constant 0 : index
    %c0_4 = arith.constant 0 : index
    %3 = vector.load %arg8[%c0_3, %c0_4] : memref<6x256xf32, #tpu.memory_space<vmem>>, vector<1x256xf32>
    %4 = vector.broadcast %3 : vector<1x256xf32> to vector<8x256xf32>
    %5 = arith.addf %2, %4 : vector<8x256xf32>
    %cst_5 = arith.constant 0.000000e+00 : f32
    %6 = vector.broadcast %cst_5 : f32 to vector<8x256xf32>
    %7 = arith.maximumf %5, %6 : vector<8x256xf32>
    %c0_6 = arith.constant 0 : index
    %c0_7 = arith.constant 0 : index
    %8 = vector.load %arg3[%c0_6, %c0_7] : memref<256x128xf32, #tpu.memory_space<vmem>>, vector<256x128xf32>
    %cst_8 = arith.constant dense<0.000000e+00> : vector<8x128xf32>
    %9 = tpu.matmul %7, %8, %cst_8 {dimension_numbers = #tpu.dot_dimension_numbers<[1], [0], [0], [1], [0, 0, 1, 1], [], []>} : vector<8x256xf32>, vector<256x128xf32>, vector<8x128xf32> -> vector<8x128xf32>
    %c1 = arith.constant 1 : index
    %c0_9 = arith.constant 0 : index
    %10 = vector.load %arg8[%c1, %c0_9] : memref<6x256xf32, #tpu.memory_space<vmem>>, vector<1x128xf32>
    %11 = vector.broadcast %10 : vector<1x128xf32> to vector<8x128xf32>
    %12 = arith.addf %9, %11 : vector<8x128xf32>
    %cst_10 = arith.constant 0.000000e+00 : f32
    %13 = vector.broadcast %cst_10 : f32 to vector<8x128xf32>
    %14 = arith.maximumf %12, %13 : vector<8x128xf32>
    %c0_11 = arith.constant 0 : index
    %c0_12 = arith.constant 0 : index
    %15 = vector.load %arg4[%c0_11, %c0_12] : memref<128x128xf32, #tpu.memory_space<vmem>>, vector<128x128xf32>
    %cst_13 = arith.constant dense<0.000000e+00> : vector<8x128xf32>
    %16 = tpu.matmul %14, %15, %cst_13 {dimension_numbers = #tpu.dot_dimension_numbers<[1], [0], [0], [1], [0, 0, 1, 1], [], []>} : vector<8x128xf32>, vector<128x128xf32>, vector<8x128xf32> -> vector<8x128xf32>
    %c2 = arith.constant 2 : index
    %c0_14 = arith.constant 0 : index
    %17 = vector.load %arg8[%c2, %c0_14] : memref<6x256xf32, #tpu.memory_space<vmem>>, vector<1x128xf32>
    %18 = vector.broadcast %17 : vector<1x128xf32> to vector<8x128xf32>
    %19 = arith.addf %16, %18 : vector<8x128xf32>
    %cst_15 = arith.constant 0.000000e+00 : f32
    %20 = vector.broadcast %cst_15 : f32 to vector<8x128xf32>
    %21 = arith.maximumf %19, %20 : vector<8x128xf32>
    %c0_16 = arith.constant 0 : index
    %c0_17 = arith.constant 0 : index
    %22 = vector.load %arg5[%c0_16, %c0_17] : memref<128x128xf32, #tpu.memory_space<vmem>>, vector<128x128xf32>
    %cst_18 = arith.constant dense<0.000000e+00> : vector<8x128xf32>
    %23 = tpu.matmul %21, %22, %cst_18 {dimension_numbers = #tpu.dot_dimension_numbers<[1], [0], [0], [1], [0, 0, 1, 1], [], []>} : vector<8x128xf32>, vector<128x128xf32>, vector<8x128xf32> -> vector<8x128xf32>
    %c3 = arith.constant 3 : index
    %c0_19 = arith.constant 0 : index
    %24 = vector.load %arg8[%c3, %c0_19] : memref<6x256xf32, #tpu.memory_space<vmem>>, vector<1x128xf32>
    %25 = vector.broadcast %24 : vector<1x128xf32> to vector<8x128xf32>
    %26 = arith.addf %23, %25 : vector<8x128xf32>
    %cst_20 = arith.constant 0.000000e+00 : f32
    %27 = vector.broadcast %cst_20 : f32 to vector<8x128xf32>
    %28 = arith.maximumf %26, %27 : vector<8x128xf32>
    %c0_21 = arith.constant 0 : index
    %c0_22 = arith.constant 0 : index
    %29 = vector.load %arg6[%c0_21, %c0_22] : memref<128x256xf32, #tpu.memory_space<vmem>>, vector<128x256xf32>
    %cst_23 = arith.constant dense<0.000000e+00> : vector<8x256xf32>
    %30 = tpu.matmul %28, %29, %cst_23 {dimension_numbers = #tpu.dot_dimension_numbers<[1], [0], [0], [1], [0, 0, 1, 1], [], []>} : vector<8x128xf32>, vector<128x256xf32>, vector<8x256xf32> -> vector<8x256xf32>
    %c4 = arith.constant 4 : index
    %c0_24 = arith.constant 0 : index
    %31 = vector.load %arg8[%c4, %c0_24] : memref<6x256xf32, #tpu.memory_space<vmem>>, vector<1x256xf32>
    %32 = vector.broadcast %31 : vector<1x256xf32> to vector<8x256xf32>
    %33 = arith.addf %30, %32 : vector<8x256xf32>
    %cst_25 = arith.constant 0.000000e+00 : f32
    %34 = vector.broadcast %cst_25 : f32 to vector<8x256xf32>
    %35 = arith.maximumf %33, %34 : vector<8x256xf32>
    %c0_26 = arith.constant 0 : index
    %c0_27 = arith.constant 0 : index
    %36 = vector.load %arg7[%c0_26, %c0_27] : memref<256x128xf32, #tpu.memory_space<vmem>>, vector<256x128xf32>
    %cst_28 = arith.constant dense<0.000000e+00> : vector<8x128xf32>
    %37 = tpu.matmul %35, %36, %cst_28 {dimension_numbers = #tpu.dot_dimension_numbers<[1], [0], [0], [1], [0, 0, 1, 1], [], []>} : vector<8x256xf32>, vector<256x128xf32>, vector<8x128xf32> -> vector<8x128xf32>
    %c5 = arith.constant 5 : index
    %c0_29 = arith.constant 0 : index
    %38 = vector.load %arg8[%c5, %c0_29] : memref<6x256xf32, #tpu.memory_space<vmem>>, vector<1x128xf32>
    %39 = vector.broadcast %38 : vector<1x128xf32> to vector<8x128xf32>
    %40 = arith.addf %37, %39 : vector<8x128xf32>
    %c0_30 = arith.constant 0 : index
    %c0_31 = arith.constant 0 : index
    %41 = vector.load %arg9[%c0_30, %c0_31] : memref<8x128xf32, #tpu.memory_space<vmem>>, vector<8x128xf32>
    tpu.vector_store %arg9[%c0_30, %c0_31], %40 {strides = array<i32>} : memref<8x128xf32, #tpu.memory_space<vmem>>, vector<8x128xf32>,
    return
  }
  func.func @transform_0(%arg0: i32) -> (i32, i32) {
    %c0_i32 = arith.constant 0 : i32
    %c0_i32_0 = arith.constant 0 : i32
    return %arg0, %c0_i32 : i32, i32
  }
  func.func @transform_1(%arg0: i32) -> (i32, i32) {
    %c0_i32 = arith.constant 0 : i32
    %c0_i32_0 = arith.constant 0 : i32
    %c0_i32_1 = arith.constant 0 : i32
    return %c0_i32, %c0_i32_0 : i32, i32
  }
  func.func @transform_2(%arg0: i32) -> (i32, i32) {
    %c0_i32 = arith.constant 0 : i32
    %c0_i32_0 = arith.constant 0 : i32
    %c0_i32_1 = arith.constant 0 : i32
    return %c0_i32, %c0_i32_0 : i32, i32
  }
  func.func @transform_3(%arg0: i32) -> (i32, i32) {
    %c0_i32 = arith.constant 0 : i32
    %c0_i32_0 = arith.constant 0 : i32
    %c0_i32_1 = arith.constant 0 : i32
    return %c0_i32, %c0_i32_0 : i32, i32
  }
  func.func @transform_4(%arg0: i32) -> (i32, i32) {
    %c0_i32 = arith.constant 0 : i32
    %c0_i32_0 = arith.constant 0 : i32
    %c0_i32_1 = arith.constant 0 : i32
    return %c0_i32, %c0_i32_0 : i32, i32
  }
  func.func @transform_5(%arg0: i32) -> (i32, i32) {
    %c0_i32 = arith.constant 0 : i32
    %c0_i32_0 = arith.constant 0 : i32
    %c0_i32_1 = arith.constant 0 : i32
    return %c0_i32, %c0_i32_0 : i32, i32
  }
  func.func @transform_6(%arg0: i32) -> (i32, i32) {
    %c0_i32 = arith.constant 0 : i32
    %c0_i32_0 = arith.constant 0 : i32
    %c0_i32_1 = arith.constant 0 : i32
    return %c0_i32, %c0_i32_0 : i32, i32
  }
  func.func @transform_7(%arg0: i32) -> (i32, i32) {
    %c0_i32 = arith.constant 0 : i32
    %c0_i32_0 = arith.constant 0 : i32
    %c0_i32_1 = arith.constant 0 : i32
    return %c0_i32, %c0_i32_0 : i32, i32
  }
  func.func @transform_8(%arg0: i32) -> (i32, i32) {
    %c0_i32 = arith.constant 0 : i32
    %c0_i32_0 = arith.constant 0 : i32
    return %arg0, %c0_i32 : i32, i32
  }
}

</mosaic_0001>

<bundles_post_ra>
// kernel: tpu_custom_call.1
= control target key start
LH: loop header
LB: loop body
LE: loop exit
PB: predicated region body
PF: predicated region fallthrough
CT: control target
= control target key end

     0   :  { %13 = vsyncpa [#allocation3], 0  ;;  %s1494_s0 = inlined_call_operand.hbm [shape: f32[8,32], index: 0, kind: input, shape index: {}]   ;;  %s1495_s1 = inlined_call_operand.hbm [shape: f32[32,256], index: 1, kind: input, shape index: {}]   ;;  %s1496_s2 = inlined_call_operand.hbm [shape: f32[256,128], index: 2, kind: input, shape index: {}]   ;;  %s1497_s3 = inlined_call_operand.hbm [shape: f32[128,128], index: 3, kind: input, shape index: {}]   ;;  %s1498_s4 = inlined_call_operand.hbm [shape: f32[128,128], index: 4, kind: input, shape index: {}]   ;;  %s1499_s5 = inlined_call_operand.hbm [shape: f32[128,256], index: 5, kind: input, shape index: {}]   ;;  %s1500_s6 = inlined_call_operand.hbm [shape: f32[256,128], index: 6, kind: input, shape index: {}]   ;;  %s1501_s7 = inlined_call_operand.vmem [shape: f32[6,256], index: 7, kind: input, shape index: {}]   ;;  %s1502_s8 = inlined_call_operand.hbm [shape: f32[8,128], index: 8, kind: output, shape index: {}]  }
   0x1   :  { %14 = vsyncpa [#allocation6], 0 }
   0x2   :  { %15 = vsyncpa [#allocation9], 0 }
   0x3   :  { %16 = vsyncpa [#allocation12], 0 }
   0x4   :  { %17 = vsyncpa [#allocation4], 0  ;;  %s1270_s27 = smov [#allocation5]   ;;  %s1084_s9 = scalar_lea.hbm %s1495_s1, 1024 }
   0x5   :  { %s33_s28 = sshll.u32 %s1270_s27, 4  ;;  %p1085_p0 = scmp.ne.s32.totalorder %s1495_s1, %s1084_s9  ;;  %s34_s28 = int_to_ptr.vmem [resolvable:$true] %s33_s28 }
   0x6   :  { %p1088_p1 = scmp.lt.u32.totalorder %s1084_s9, %s1495_s1 }
   0x8   :  { %p1090_p2 = pnand %p1088_p1, %p1085_p0 }
   0xa   :  { %1093 = shalt.err (!%p1090_p2)
}
   0xb   :  { %s1094_s14 = scalar_lea.vmem %s34_s28, 1024  ;;  %p1099_p4 = scmp.lt.s32.totalorder %s34_s28, %s34_s28 }
   0xc   :  { %p1095_p3 = scmp.ne.s32.totalorder %s34_s28, %s1094_s14  ;;  %p1100_p5 = scmp.lt.s32.totalorder %s1094_s14, %s1094_s14 }
   0xe   :  { %p1101_p6 = por %p1100_p5, %p1099_p4 }
  0x10   :  { %p1102_p7 = pnand %p1101_p6, %p1095_p3 }
  0x12   :  { %1105 = shalt.err (!%p1102_p7)
}
  0x13   :  { %s1271_s15 = smov 256   ;;  %s1272_s16 = smov 16  }
  0x14   :  { %39 = dma.hbm_to_vmem [thread:$0]  %s1495_s1, 1024, %s34_s28, [#allocation6], %s1271_s15, %s1271_s15, %s1272_s16  }
  0x15   :  { %s1273_s19 = smov [#allocation8]   ;;  %s1274_s21 = smov [#allocation11]  }
  0x16   :  { %s57_s20 = sshll.u32 %s1273_s19, 4  ;;  %s81_s22 = sshll.u32 %s1274_s21, 4  ;;  %s58_s20 = int_to_ptr.vmem [resolvable:$true] %s57_s20  ;;  %s82_s22 = int_to_ptr.vmem [resolvable:$true] %s81_s22 }
  0x17   :  { %s1106_s25 = scalar_lea.hbm %s1497_s3, 2048 }
  0x18   :  { %p1107_p8 = scmp.ne.s32.totalorder %s1497_s3, %s1106_s25  ;;  %p1110_p9 = scmp.lt.u32.totalorder %s1106_s25, %s1497_s3 }
  0x1a   :  { %p1112_p10 = pnand %p1110_p9, %p1107_p8 }
  0x1c   :  { %1115 = shalt.err (!%p1112_p10)
}
  0x1d   :  { %s1116_s1 = scalar_lea.vmem %s58_s20, 2048  ;;  %p1121_p12 = scmp.lt.s32.totalorder %s58_s20, %s58_s20 }
  0x1e   :  { %p1117_p11 = scmp.ne.s32.totalorder %s58_s20, %s1116_s1  ;;  %p1122_p13 = scmp.lt.s32.totalorder %s1116_s1, %s1116_s1 }
  0x20   :  { %p1123_p0 = por %p1122_p13, %p1121_p12 }
  0x22   :  { %p1124_p1 = pnand %p1123_p0, %p1117_p11 }
  0x24   :  { %1127 = shalt.err (!%p1124_p1)
}
  0x25   :  { %s1275_s28 = smov 128   ;;  %s1276_s9 = smov 8  }
  0x26   :  { %63 = dma.hbm_to_vmem [thread:$0]  %s1497_s3, 2048, %s58_s20, [#allocation9], %s1275_s28, %s1275_s28, %s1276_s9  }
  0x27   :  { %s1128_s14 = scalar_lea.hbm %s1499_s5, 4096 }
  0x28   :  { %p1129_p2 = scmp.ne.s32.totalorder %s1499_s5, %s1128_s14  ;;  %p1132_p3 = scmp.lt.u32.totalorder %s1128_s14, %s1499_s5 }
  0x2a   :  { %p1134_p4 = pnand %p1132_p3, %p1129_p2 }
  0x2c   :  { %1137 = shalt.err (!%p1134_p4)
}
  0x2d   :  { %s1138_s23 = scalar_lea.vmem %s82_s22, 4096  ;;  %p1143_p6 = scmp.lt.s32.totalorder %s82_s22, %s82_s22 }
  0x2e   :  { %p1139_p5 = scmp.ne.s32.totalorder %s82_s22, %s1138_s23  ;;  %p1144_p7 = scmp.lt.s32.totalorder %s1138_s23, %s1138_s23 }
  0x30   :  { %p1145_p8 = por %p1144_p7, %p1143_p6 }
  0x32   :  { %p1146_p9 = pnand %p1145_p8, %p1139_p5 }
  0x34   :  { %1149 = shalt.err (!%p1146_p9)
}
  0x35   :  { %87 = dma.hbm_to_vmem [thread:$0]  %s1499_s5, 4096, %s82_s22, [#allocation12], %s1271_s15, %s1271_s15, %s1272_s16  }
  0x36   :  { %s1277_s24 = smov [#allocation2]   ;;  %s1278_s26 = smov [#allocation7]  }
  0x37   :  { %s24_s25 = sshll.u32 %s1277_s24, 4  ;;  %s45_s27 = sshll.u32 %s1278_s26, 4  ;;  %s25_s25 = int_to_ptr.vmem [resolvable:$true] %s24_s25  ;;  %s46_s27 = int_to_ptr.vmem [resolvable:$true] %s45_s27 }
  0x38   :  { %s1150_s1 = scalar_lea.hbm %s1494_s0, 128 }
  0x39   :  { %p1151_p10 = scmp.ne.s32.totalorder %s1494_s0, %s1150_s1  ;;  %p1154_p11 = scmp.lt.u32.totalorder %s1150_s1, %s1494_s0 }
  0x3b   :  { %p1156_p12 = pnand %p1154_p11, %p1151_p10 }
  0x3d   :  { %1159 = shalt.err (!%p1156_p12)
}
  0x3e   :  { %s1160_s5 = scalar_lea.vmem %s25_s25, 128  ;;  %p1165_p0 = scmp.lt.s32.totalorder %s25_s25, %s25_s25 }
  0x3f   :  { %p1161_p13 = scmp.ne.s32.totalorder %s25_s25, %s1160_s5  ;;  %p1166_p1 = scmp.lt.s32.totalorder %s1160_s5, %s1160_s5 }
  0x41   :  { %p1167_p2 = por %p1166_p1, %p1165_p0 }
  0x43   :  { %p1168_p3 = pnand %p1167_p2, %p1161_p13 }
  0x45   :  { %1171 = shalt.err (!%p1168_p3)
}
  0x46   :  { %27 = dma.hbm_to_vmem [thread:$0]  %s1494_s0, 128, %s25_s25, [#allocation3]  }
  0x47   :  { %s1172_s17 = scalar_lea.hbm %s1496_s2, 4096 }
  0x48   :  { %p1173_p4 = scmp.ne.s32.totalorder %s1496_s2, %s1172_s17  ;;  %p1176_p5 = scmp.lt.u32.totalorder %s1172_s17, %s1496_s2 }
  0x4a   :  { %p1178_p6 = pnand %p1176_p5, %p1173_p4 }
  0x4c   :  { %1181 = shalt.err (!%p1178_p6)
}
  0x4d   :  { %s1182_s3 = scalar_lea.vmem %s46_s27, 4096  ;;  %p1187_p8 = scmp.lt.s32.totalorder %s46_s27, %s46_s27 }
  0x4e   :  { %p1183_p7 = scmp.ne.s32.totalorder %s46_s27, %s1182_s3  ;;  %p1188_p9 = scmp.lt.s32.totalorder %s1182_s3, %s1182_s3 }
  0x50   :  { %p1189_p10 = por %p1188_p9, %p1187_p8 }
  0x52   :  { %p1190_p11 = pnand %p1189_p10, %p1183_p7 }
  0x54   :  { %1193 = shalt.err (!%p1190_p11)
}
  0x55   :  { %51 = dma.hbm_to_vmem [thread:$0]  %s1496_s2, 4096, %s46_s27, [#allocation6], %s1275_s28, %s1275_s28, %s1276_s9  }
  0x56   :  { %s1279_s24 = smov [#allocation10]   ;;  %s1280_s26 = smov [#allocation13]  }
  0x57   :  { %s69_s25 = sshll.u32 %s1279_s24, 4  ;;  %s93_s29 = sshll.u32 %s1280_s26, 4  ;;  %s70_s25 = int_to_ptr.vmem [resolvable:$true] %s69_s25  ;;  %s94_s29 = int_to_ptr.vmem [resolvable:$true] %s93_s29 }
  0x58   :  { %s1194_s10 = scalar_lea.hbm %s1498_s4, 2048 }
  0x59   :  { %p1195_p12 = scmp.ne.s32.totalorder %s1498_s4, %s1194_s10  ;;  %p1198_p13 = scmp.lt.u32.totalorder %s1194_s10, %s1498_s4 }
  0x5b   :  { %p1200_p0 = pnand %p1198_p13, %p1195_p12 }
  0x5d   :  { %1203 = shalt.err (!%p1200_p0)
}
  0x5e   :  { %s1204_s2 = scalar_lea.vmem %s70_s25, 2048  ;;  %p1209_p2 = scmp.lt.s32.totalorder %s70_s25, %s70_s25 }
  0x5f   :  { %p1205_p1 = scmp.ne.s32.totalorder %s70_s25, %s1204_s2  ;;  %p1210_p3 = scmp.lt.s32.totalorder %s1204_s2, %s1204_s2 }
  0x61   :  { %p1211_p4 = por %p1210_p3, %p1209_p2 }
  0x63   :  { %p1212_p5 = pnand %p1211_p4, %p1205_p1 }
  0x65   :  { %1215 = shalt.err (!%p1212_p5)
}
  0x66   :  { %75 = dma.hbm_to_vmem [thread:$0]  %s1498_s4, 2048, %s70_s25, [#allocation9], %s1275_s28, %s1275_s28, %s1276_s9  }
  0x67   :  { %s1216_s14 = scalar_lea.hbm %s1500_s6, 4096 }
  0x68   :  { %p1217_p6 = scmp.ne.s32.totalorder %s1500_s6, %s1216_s14  ;;  %p1220_p7 = scmp.lt.u32.totalorder %s1216_s14, %s1500_s6 }
  0x6a   :  { %p1222_p8 = pnand %p1220_p7, %p1217_p6 }
  0x6c   :  { %1225 = shalt.err (!%p1222_p8)
}
  0x6d   :  { %s1226_s23 = scalar_lea.vmem %s94_s29, 4096  ;;  %p1231_p10 = scmp.lt.s32.totalorder %s94_s29, %s94_s29 }
  0x6e   :  { %p1227_p9 = scmp.ne.s32.totalorder %s94_s29, %s1226_s23  ;;  %p1232_p11 = scmp.lt.s32.totalorder %s1226_s23, %s1226_s23 }
  0x70   :  { %p1233_p12 = por %p1232_p11, %p1231_p10 }
  0x72   :  { %p1234_p13 = pnand %p1233_p12, %p1227_p9 }
  0x74   :  { %1237 = shalt.err (!%p1234_p13)
}
  0x75   :  { %99 = dma.hbm_to_vmem [thread:$0]  %s1500_s6, 4096, %s94_s29, [#allocation12], %s1275_s28, %s1275_s28, %s1276_s9  }
  0x76   :  { %1260 = dma.done.wait [#allocation3], 128  }
  0x77   :  { %1261 = vsyncadd [#allocation3], 4294967168 }
  0x78   :  { %1262 = dma.done.wait [#allocation6], 5120  }
  0x79   :  { %1263 = vsyncadd [#allocation6], 4294962176 }
  0x7a   :  { %1264 = dma.done.wait [#allocation9], 4096  }
  0x7b   :  { %1265 = vsyncadd [#allocation9], 4294963200 }
  0x7c   :  { %1266 = dma.done.wait [#allocation12], 8192  }
  0x7d   :  { %1267 = vsyncadd [#allocation12], 4294959104  ;;  %v1281_v0 = vmov 0.0   ;;  %v125_v1 = vld [vmem:[#allocation5 + $0x8] sm:$0xff]  ;;  %v127_v2 = vld [vmem:[#allocation5 + $0x18] sm:$0xff]  ;;  %vm144_vm0 = vcmask 261120  }
  0x7e   :  { %212 = vmatprep.mubr.f32.mxu0 %v1281_v0  ;;  %v124_v3 = vld [vmem:[#allocation5] sm:$0xff]  ;;  %v917_v4 = vpack.c.bf16 %v127_v2, %v125_v1  ;;  %v126_v5 = vld [vmem:[#allocation5 + $0x10] sm:$0xff]  ;;  %v129_v6 = vld [vmem:[#allocation5 + $0x28] sm:$0xff]  ;;  %v1282_v2 = vmov 0.0|0.0   ;;  %vm1283_vm1 = vmmov 0   ;;  %s1284_s11 = smov [#allocation14]  }
  0x7f   :  { %v131_v7 = vld [vmem:[#allocation5 + $0x38] sm:$0xff]  ;;  %v919_v8 = vpack.c.bf16 %v126_v5, %v124_v3  ;;  %v128_v10 = vld [vmem:[#allocation5 + $0x20] sm:$0xff]  ;;  %v130_v11 = vld [vmem:[#allocation5 + $0x30] sm:$0xff]  ;;  %s729_s12 = sshll.u32 %s1284_s11, 4  ;;  %s730_s12 = int_to_ptr.vmem [resolvable:$true] %s729_s12 }
  0x80   :  { %v921_v9 = vpack.c.bf16 %v131_v7, %v129_v6  ;;  %918 = vmatprep.subr.bf16.mxu0 %v917_v4  ;;  %v237_v12 = vld [vmem:[#allocation7 + $0x80] sm:$0xff]  ;;  %v238_v13 = vld [vmem:[#allocation7 + $0x88] sm:$0xff]  ;;  %v923_v15 = vpack.c.bf16 %v130_v11, %v128_v10  ;;  %v239_v18 = vld [vmem:[#allocation7 + $0x90] sm:$0xff]  ;;  %s1238_s13 = scalar_lea.vmem %s730_s12, 128  ;;  %p1243_p1 = scmp.lt.s32.totalorder %s730_s12, %s730_s12 }
  0x81   :  { %v221_v14 = vld [vmem:[#allocation7] sm:$0xff]  ;;  %920 = vmatpush1.bf16.msra.mxu0 %v919_v8  ;;  %v925_v16 = vpack.c.bf16 %v238_v13, %v237_v12  ;;  %v222_v17 = vld [vmem:[#allocation7 + $0x8] sm:$0xff]  ;;  %v240_v19 = vld [vmem:[#allocation7 + $0x98] sm:$0xff]  ;;  %p1239_p0 = scmp.ne.s32.totalorder %s730_s12, %s1238_s13  ;;  %p1244_p2 = scmp.lt.s32.totalorder %s1238_s13, %s1238_s13 }
  0x82   :  { %922 = vmatprep.subr.bf16.mxu0 %v921_v9  ;;  %v927_v20 = vpack.c.bf16 %v222_v17, %v221_v14  ;;  %v929_v21 = vpack.c.bf16 %v240_v19, %v239_v18  ;;  %v223_v22 = vld [vmem:[#allocation7 + $0x10] sm:$0xff]  ;;  %v224_v23 = vld [vmem:[#allocation7 + $0x18] sm:$0xff]  ;;  %v241_v24 = vld [vmem:[#allocation7 + $0xa0] sm:$0xff]  ;;  %v134_v18 = vlaneseq }
  0x83   :  { %926 = vmatprep.subr.bf16.mxu1 %v925_v16  ;;  %v242_v25 = vld [vmem:[#allocation7 + $0xa8] sm:$0xff]  ;;  %v931_v26 = vpack.c.bf16 %v224_v23, %v223_v22  ;;  %v123_v27 = vld [vmem:[#allocation2] sm:$0xff]  ;;  %v225_v29 = vld [vmem:[#allocation7 + $0x20] sm:$0xff]  ;;  %p1245_p3 = por %p1244_p2, %p1243_p1 }
  0x84   :  { %928 = vmatpush3.bf16.msra.mxu1 %v927_v20  ;;  %v933_v28 = vpack.c.bf16 %v242_v25, %v241_v24  ;;  %v226_v30 = vld [vmem:[#allocation7 + $0x28] sm:$0xff]  ;;  %v243_v31 = vld [vmem:[#allocation7 + $0xb0] sm:$0xff]  ;;  %v244_v32 = vld [vmem:[#allocation7 + $0xb8] sm:$0xff]  ;;  %v1441_v19 = vshrl.u32 %v134_v18, 7 }
  0x85   :  { %924 = vmatpush1.bf16.msra.mxu0 %v923_v15  ;;  %930 = vmatprep.subr.bf16.mxu1 %v929_v21  ;;  %v935_v33 = vpack.c.bf16 %v226_v30, %v225_v29  ;;  %v937_v34 = vpack.c.bf16 %v244_v32, %v243_v31  ;;  %v227_v35 = vld [vmem:[#allocation7 + $0x30] sm:$0xff]  ;;  %v228_v36 = vld [vmem:[#allocation7 + $0x38] sm:$0xff]  ;;  %v245_v37 = vld [vmem:[#allocation7 + $0xc0] sm:$0xff]  ;;  %p1246_p4 = pnand %p1245_p3, %p1239_p0 }
  0x86   :  { %v246_v38 = vld [vmem:[#allocation7 + $0xc8] sm:$0xff]  ;;  %v939_v39 = vpack.c.bf16 %v228_v36, %v227_v35  ;;  %v229_v41 = vld [vmem:[#allocation7 + $0x40] sm:$0xff]  ;;  %v247_v43 = vld [vmem:[#allocation7 + $0xd0] sm:$0xff]  ;;  %957 = vmatprep.subr.bf16.mxu0 %v1282_v2  ;;  %v136_v20 = vsub.s32 0, %v1441_v19  ;;  %v140_v22 = vsub.s32 1, %v1441_v19 }
  0x87   :  { %v941_v40 = vpack.c.bf16 %v246_v38, %v245_v37  ;;  %v230_v42 = vld [vmem:[#allocation7 + $0x48] sm:$0xff]  ;;  %v248_v44 = vld [vmem:[#allocation7 + $0xd8] sm:$0xff]  ;;  %v231_v47 = vld [vmem:[#allocation7 + $0x50] sm:$0xff] }
  0x88   :  { %741 = vmatmul.mubr.msk.f32.vlgmr.msra.gmra.mrb[0].mxu0 %vm144_vm0, %v123_v27  ;;  %932 = vmatpush3.bf16.msra.mxu1 %v931_v26  ;;  %v943_v45 = vpack.c.bf16 %v230_v42, %v229_v41  ;;  %v945_v46 = vpack.c.bf16 %v248_v44, %v247_v43  ;;  %v232_v48 = vld [vmem:[#allocation7 + $0x58] sm:$0xff]  ;;  %v249_v49 = vld [vmem:[#allocation7 + $0xe0] sm:$0xff]  ;;  %v250_v50 = vld [vmem:[#allocation7 + $0xe8] sm:$0xff] }
  0x89   :  { %934 = vmatprep.subr.bf16.mxu1 %v933_v28  ;;  %v947_v51 = vpack.c.bf16 %v232_v48, %v231_v47  ;;  %v949_v52 = vpack.c.bf16 %v250_v50, %v249_v49  ;;  %v233_v53 = vld [vmem:[#allocation7 + $0x60] sm:$0xff]  ;;  %v234_v54 = vld [vmem:[#allocation7 + $0x68] sm:$0xff]  ;;  %v251_v56 = vld [vmem:[#allocation7 + $0xf0] sm:$0xff]  ;;  %879 = vmatprep.mubr.msk.f32.mxu0 %vm1283_vm1, %v1281_v0 }
  0x8a   :  { %v951_v55 = vpack.c.bf16 %v234_v54, %v233_v53  ;;  %v252_v57 = vld [vmem:[#allocation7 + $0xf8] sm:$0xff]  ;;  %v235_v59 = vld [vmem:[#allocation7 + $0x70] sm:$0xff]  ;;  %v325_v62 = vld [vmem:[#allocation8] sm:$0xff] }
  0x8b   :  { %v953_v58 = vpack.c.bf16 %v252_v57, %v251_v56  ;;  %v236_v60 = vld [vmem:[#allocation7 + $0x78] sm:$0xff]  ;;  %v326_v63 = vld [vmem:[#allocation8 + $0x8] sm:$0xff]  ;;  %v327_v1 = vld [vmem:[#allocation8 + $0x10] sm:$0xff] }
  0x8c   :  { %936 = vmatpush3.bf16.msra.mxu1 %v935_v33  ;;  %v955_v61 = vpack.c.bf16 %v236_v60, %v235_v59  ;;  %v958_v3 = vpack.c.bf16 %v326_v63, %v325_v62  ;;  %v328_v4 = vld [vmem:[#allocation8 + $0x18] sm:$0xff]  ;;  %v329_v6 = vld [vmem:[#allocation8 + $0x20] sm:$0xff]  ;;  %v330_v7 = vld [vmem:[#allocation8 + $0x28] sm:$0xff] }
  0x8d   :  { %938 = vmatprep.subr.bf16.mxu1 %v937_v34  ;;  %v961_v5 = vpack.c.bf16 %v328_v4, %v327_v1  ;;  %v964_v8 = vpack.c.bf16 %v330_v7, %v329_v6  ;;  %v331_v9 = vld [vmem:[#allocation8 + $0x30] sm:$0xff]  ;;  %v332_v10 = vld [vmem:[#allocation8 + $0x38] sm:$0xff]  ;;  %v333_v12 = vld [vmem:[#allocation8 + $0x40] sm:$0xff] }
  0x8e   :  { %959 = vmatpush3.bf16.msra.mxu0 %v958_v3  ;;  %v967_v11 = vpack.c.bf16 %v332_v10, %v331_v9  ;;  %v334_v13 = vld [vmem:[#allocation8 + $0x48] sm:$0xff]  ;;  %v335_v15 = vld [vmem:[#allocation8 + $0x50] sm:$0xff]  ;;  %v336_v16 = vld [vmem:[#allocation8 + $0x58] sm:$0xff] }
  0x8f   :  { %960 = vmatprep.subr.bf16.mxu0 %v1282_v2  ;;  %v970_v14 = vpack.c.bf16 %v334_v13, %v333_v12  ;;  %v973_v17 = vpack.c.bf16 %v336_v16, %v335_v15  ;;  %v132_v21 = vld [vmem:[%s1501_s7] ss:$8 sm:$0x3]  ;;  %v337_v31 = vld [vmem:[#allocation8 + $0x60] sm:$0xff]  ;;  %v340_v35 = vld [vmem:[#allocation8 + $0x78] sm:$0xff] }
  0x90   :  { %940 = vmatpush3.bf16.msra.mxu1 %v939_v39  ;;  %v137_v23 = vrot.slane %v132_v21, %v136_v20  ;;  %v141_v24 = vrot.slane %v132_v21, %v140_v22  ;;  %v338_v32 = vld [vmem:[#allocation8 + $0x68] sm:$0xff]  ;;  %v339_v34 = vld [vmem:[#allocation8 + $0x70] sm:$0xff]  ;;  %v413_v37 = vld [vmem:[#allocation10] sm:$0xff] }
  0x91   :  { %942 = vmatprep.subr.bf16.mxu1 %v941_v40  ;;  %v976_v33 = vpack.c.bf16 %v338_v32, %v337_v31  ;;  %v979_v36 = vpack.c.bf16 %v340_v35, %v339_v34  ;;  %v414_v38 = vld [vmem:[#allocation10 + $0x8] sm:$0xff]  ;;  %v415_v39 = vld [vmem:[#allocation10 + $0x10] sm:$0xff]  ;;  %v416_v41 = vld [vmem:[#allocation10 + $0x18] sm:$0xff] }
  0x92   :  { %962 = vmatpush3.bf16.msra.mxu0 %v961_v5  ;;  %v982_v40 = vpack.c.bf16 %v414_v38, %v413_v37  ;;  %v985_v42 = vpack.c.bf16 %v416_v41, %v415_v39  ;;  %v417_v43 = vld [vmem:[#allocation10 + $0x20] sm:$0xff]  ;;  %v418_v44 = vld [vmem:[#allocation10 + $0x28] sm:$0xff]  ;;  %v420_v47 = vld [vmem:[#allocation10 + $0x38] sm:$0xff] }
  0x93   :  { %963 = vmatprep.subr.bf16.mxu0 %v1282_v2  ;;  %v421_v49 = vld [vmem:[#allocation10 + $0x40] sm:$0xff]  ;;  %v422_v50 = vld [vmem:[#allocation10 + $0x48] sm:$0xff]  ;;  %v424_v53 = vld [vmem:[#allocation10 + $0x58] sm:$0xff] }
  0x94   :  { %944 = vmatpush3.bf16.msra.mxu1 %v943_v45  ;;  %v988_v45 = vpack.c.bf16 %v418_v44, %v417_v43  ;;  %v426_v56 = vld [vmem:[#allocation10 + $0x68] sm:$0xff]  ;;  %v427_v1 = vld [vmem:[#allocation10 + $0x70] sm:$0xff]  ;;  %v428_v3 = vld [vmem:[#allocation10 + $0x78] sm:$0xff] }
  0x95   :  { %946 = vmatprep.subr.bf16.mxu1 %v945_v46  ;;  %v419_v46 = vld [vmem:[#allocation10 + $0x30] sm:$0xff]  ;;  %v253_v59 = vld [vmem:[%s1501_s7 + $0x1] ss:$0 sm:$0xff]  ;;  %v1003_v4 = vpack.c.bf16 %v428_v3, %v427_v1  ;;  %v504_v6 = vld [vmem:[#allocation11 + $0x18] sm:$0xff] }
  0x96   :  { %965 = vmatpush3.bf16.msra.mxu0 %v964_v8  ;;  %v991_v48 = vpack.c.bf16 %v420_v47, %v419_v46  ;;  %v502_v5 = vld [vmem:[#allocation11 + $0x8] sm:$0xff]  ;;  %v501_v7 = vld [vmem:[#allocation11] sm:$0xff]  ;;  %v503_v8 = vld [vmem:[#allocation11 + $0x10] sm:$0xff] }
  0x97   :  { %966 = vmatprep.subr.bf16.mxu0 %v1282_v2  ;;  %v506_v9 = vld [vmem:[#allocation11 + $0x28] sm:$0xff]  ;;  %v508_v10 = vld [vmem:[#allocation11 + $0x38] sm:$0xff]  ;;  %v505_v13 = vld [vmem:[#allocation11 + $0x20] sm:$0xff] }
  0x98   :  { %948 = vmatpush3.bf16.msra.mxu1 %v947_v51  ;;  %v994_v51 = vpack.c.bf16 %v422_v50, %v421_v49  ;;  %v1009_v12 = vpack.c.bf16 %v508_v10, %v506_v9  ;;  %v510_v15 = vld [vmem:[#allocation11 + $0x48] sm:$0xff]  ;;  %v512_v16 = vld [vmem:[#allocation11 + $0x58] sm:$0xff]  ;;  %v509_v18 = vld [vmem:[#allocation11 + $0x40] sm:$0xff] }
  0x99   :  { %950 = vmatprep.subr.bf16.mxu1 %v949_v52  ;;  %v423_v52 = vld [vmem:[#allocation10 + $0x50] sm:$0xff]  ;;  %v522_v35 = vld [vmem:[#allocation11 + $0xa8] sm:$0xff]  ;;  %v521_v39 = vld [vmem:[#allocation11 + $0xa0] sm:$0xff] }
  0x9a   :  { %968 = vmatpush3.bf16.msra.mxu0 %v967_v11  ;;  %v997_v54 = vpack.c.bf16 %v424_v53, %v423_v52  ;;  %v1007_v11 = vpack.c.bf16 %v503_v8, %v501_v7  ;;  %v511_v21 = vld [vmem:[#allocation11 + $0x50] sm:$0xff]  ;;  %v526_v41 = vld [vmem:[#allocation11 + $0xc8] sm:$0xff]  ;;  %v638_v3 = vld [vmem:[#allocation13 + $0x98] sm:$0xff] }
  0x9b   :  { %969 = vmatprep.subr.bf16.mxu0 %v1282_v2  ;;  %v519_v34 = vld [vmem:[#allocation11 + $0x90] sm:$0xff]  ;;  %v530_v53 = vld [vmem:[#allocation11 + $0xe8] sm:$0xff]  ;;  %v622_v7 = vld [vmem:[#allocation13 + $0x18] sm:$0xff] }
  0x9c   :  { %952 = vmatpush3.bf16.msra.mxu1 %v951_v55  ;;  %v425_v55 = vld [vmem:[#allocation10 + $0x60] sm:$0xff]  ;;  %v527_v46 = vld [vmem:[#allocation11 + $0xd0] sm:$0xff]  ;;  %v640_v8 = vld [vmem:[#allocation13 + $0xa8] sm:$0xff] }
  0x9d   :  { %954 = vmatprep.subr.bf16.mxu1 %v953_v58  ;;  %v1000_v57 = vpack.c.bf16 %v426_v56, %v425_v55  ;;  %v529_v56 = vld [vmem:[#allocation11 + $0xe0] sm:$0xff]  ;;  %v637_v1 = vld [vmem:[#allocation13 + $0x90] sm:$0xff] }
  0x9e   :  { %971 = vmatpush3.bf16.msra.mxu0 %v970_v14  ;;  %v507_v14 = vld [vmem:[#allocation11 + $0x30] sm:$0xff] }
  0x9f   :  { %972 = vmatprep.subr.bf16.mxu0 %v1282_v2 }
  0xa0   :  { %956 = vmatpush3.bf16.msra.mxu1 %v955_v61 }
  0xa1   :  { %981 = vmatprep.subr.bf16.mxu1 %v1282_v2 }
  0xa2   :  { %974 = vmatpush3.bf16.msra.mxu0 %v973_v17  ;;  %v1013_v17 = vpack.c.bf16 %v512_v16, %v510_v15 }
  0xa3   :  { %975 = vmatprep.subr.bf16.mxu0 %v1282_v2 }
  0xa6   :  { %977 = vmatpush3.bf16.msra.mxu0 %v976_v33  ;;  %v517_v33 = vld [vmem:[#allocation11 + $0x80] sm:$0xff] }
  0xa7   :  { %978 = vmatprep.subr.bf16.mxu0 %v1282_v2  ;;  %v1023_v37 = vpack.c.bf16 %v519_v34, %v517_v33  ;;  %v647_v33 = vld [vmem:[#allocation13 + $0xe0] sm:$0xff]  ;;  %v648_v34 = vld [vmem:[#allocation13 + $0xe8] sm:$0xff] }
  0xaa   :  { %980 = vmatpush3.bf16.msra.mxu0 %v979_v36  ;;  %v524_v36 = vld [vmem:[#allocation11 + $0xb8] sm:$0xff] }
  0xab   :  { %v1025_v38 = vpack.c.bf16 %v524_v36, %v522_v35  ;;  %v1061_v36 = vpack.c.bf16 %v648_v34, %v647_v33 }
 0x15b   :  { %v214_v25 = vpop.f32.mrb[0].mxu0 }
 0x15c   :  { %v215_v26 = vadd.f32 %v214_v25, %v137_v23  ;;  %v216_v27 = vpop.f32.mrb[1].mxu0  ;;  %v514_v23 = vld [vmem:[#allocation11 + $0x68] sm:$0xff]  ;;  %v1015_v25 = vpack.c.bf16 %v511_v21, %v509_v18  ;;  %v643_v18 = vld [vmem:[#allocation13 + $0xc0] sm:$0xff] }
 0x15d   :  { %v217_v28 = vadd.f32 %v216_v27, %v141_v24  ;;  %v516_v24 = vld [vmem:[#allocation11 + $0x78] sm:$0xff]  ;;  %v513_v27 = vld [vmem:[#allocation11 + $0x60] sm:$0xff]  ;;  %v644_v21 = vld [vmem:[#allocation13 + $0xc8] sm:$0xff] }
 0x15e   :  { %v219_v30 = vmax.f32 %v215_v26, 0.0  ;;  %v1017_v26 = vpack.c.bf16 %v516_v24, %v514_v23  ;;  %v1053_v24 = vpack.c.bf16 %v644_v21, %v643_v18 }
 0x15f   :  { %v220_v29 = vmax.f32 %v217_v28, 0.0  ;;  %v515_v28 = vld [vmem:[#allocation11 + $0x70] sm:$0xff] }
 0x160   :  { %v1019_v31 = vpack.c.bf16 %v515_v28, %v513_v27  ;;  %v645_v27 = vld [vmem:[#allocation13 + $0xd0] sm:$0xff]  ;;  %v646_v28 = vld [vmem:[#allocation13 + $0xd8] sm:$0xff] }
 0x161   :  { %318 = vmatprep.mubr.f32.mxu1 %v220_v29  ;;  %v518_v29 = vld [vmem:[#allocation11 + $0x88] sm:$0xff] }
 0x162   :  { %319 = vmatmul.mubr.f32.vlgmr.msra.gmra.mrb[0].mxu1 %v219_v30  ;;  %v520_v30 = vld [vmem:[#allocation11 + $0x98] sm:$0xff] }
 0x163   :  { %914 = vmatprep.mubr.msk.f32.mxu1 %vm1283_vm1, %v1281_v0  ;;  %983 = vmatpush3.bf16.msra.mxu1 %v982_v40  ;;  %v1021_v32 = vpack.c.bf16 %v520_v30, %v518_v29  ;;  %v523_v40 = vld [vmem:[#allocation11 + $0xb0] sm:$0xff]  ;;  %v1057_v30 = vpack.c.bf16 %v646_v28, %v645_v27 }
 0x164   :  { %984 = vmatprep.subr.bf16.mxu1 %v1282_v2  ;;  %v1027_v43 = vpack.c.bf16 %v523_v40, %v521_v39 }
 0x167   :  { %986 = vmatpush3.bf16.msra.mxu1 %v985_v42  ;;  %v528_v42 = vld [vmem:[#allocation11 + $0xd8] sm:$0xff] }
 0x168   :  { %987 = vmatprep.subr.bf16.mxu1 %v1282_v2  ;;  %v1029_v44 = vpack.c.bf16 %v528_v42, %v526_v41  ;;  %v631_v42 = vld [vmem:[#allocation13 + $0x60] sm:$0xff] }
 0x16b   :  { %989 = vmatpush3.bf16.msra.mxu1 %v988_v45  ;;  %v525_v45 = vld [vmem:[#allocation11 + $0xc0] sm:$0xff] }
 0x16c   :  { %990 = vmatprep.subr.bf16.mxu1 %v1282_v2  ;;  %v1031_v47 = vpack.c.bf16 %v527_v46, %v525_v45  ;;  %v649_v45 = vld [vmem:[#allocation13 + $0xf0] sm:$0xff]  ;;  %v650_v46 = vld [vmem:[#allocation13 + $0xf8] sm:$0xff] }
 0x16f   :  { %992 = vmatpush3.bf16.msra.mxu1 %v991_v48  ;;  %v341_v48 = vld [vmem:[%s1501_s7 + $0x2] ss:$0 sm:$0xff] }
 0x170   :  { %993 = vmatprep.subr.bf16.mxu1 %v1282_v2 }
 0x173   :  { %995 = vmatpush3.bf16.msra.mxu1 %v994_v51 }
 0x174   :  { %996 = vmatprep.subr.bf16.mxu1 %v1282_v2 }
 0x177   :  { %998 = vmatpush3.bf16.msra.mxu1 %v997_v54  ;;  %v532_v54 = vld [vmem:[#allocation11 + $0xf8] sm:$0xff] }
 0x178   :  { %999 = vmatprep.subr.bf16.mxu1 %v1282_v2  ;;  %v1033_v55 = vpack.c.bf16 %v532_v54, %v530_v53 }
 0x17b   :  { %1001 = vmatpush3.bf16.msra.mxu1 %v1000_v57  ;;  %v531_v57 = vld [vmem:[#allocation11 + $0xf0] sm:$0xff] }
 0x17c   :  { %1002 = vmatprep.subr.bf16.mxu1 %v1282_v2  ;;  %v1005_v2 = vpack.c.bf16 %v504_v6, %v502_v5  ;;  %v1041_v5 = vpack.c.bf16 %v638_v3, %v637_v1  ;;  %v621_v6 = vld [vmem:[#allocation13 + $0x10] sm:$0xff] }
 0x17d   :  { %v1043_v9 = vpack.c.bf16 %v622_v7, %v621_v6 }
 0x17e   :  { %1006 = vmatprep.subr.bf16.mxu0 %v1005_v2  ;;  %v639_v2 = vld [vmem:[#allocation13 + $0xa0] sm:$0xff] }
 0x17f   :  { %1004 = vmatpush3.bf16.msra.mxu1 %v1003_v4  ;;  %v1045_v10 = vpack.c.bf16 %v640_v8, %v639_v2 }
 0x235   :  { %v775_v58 = vpop.f32.mrb[0].mxu1 }
 0x236   :  { %v776_v60 = vpop.f32.mrb[1].mxu1 }
 0x237   :  { %v777_v61 = vadd.f32 %v776_v60, %v775_v58  ;;  %v1035_v58 = vpack.c.bf16 %v531_v57, %v529_v56  ;;  %v636_v60 = vld [vmem:[#allocation13 + $0x88] sm:$0xff] }
 0x239   :  { %v321_v62 = vadd.f32 %v777_v61, %v253_v59  ;;  %v635_v59 = vld [vmem:[#allocation13 + $0x80] sm:$0xff] }
 0x23a   :  { %v619_v61 = vld [vmem:[#allocation13] sm:$0xff] }
 0x23b   :  { %v324_v63 = vmax.f32 %v321_v62, 0.0  ;;  %v1037_v62 = vpack.c.bf16 %v636_v60, %v635_v59 }
 0x23d   :  { %880 = vmatmul.mubr.f32.vlgmr.msra.gmra.mrb[2].mxu0 %v324_v63  ;;  %v620_v63 = vld [vmem:[#allocation13 + $0x8] sm:$0xff]  ;;  %1038 = vmatprep.subr.bf16.mxu1 %v1037_v62 }
 0x23e   :  { %610 = vmatprep.mubr.f32.mxu0 %v1281_v0  ;;  %1008 = vmatpush1.bf16.msra.mxu0 %v1007_v11  ;;  %v1011_v0 = vpack.c.bf16 %v507_v14, %v505_v13  ;;  %v1039_v4 = vpack.c.bf16 %v620_v63, %v619_v61  ;;  %v623_v11 = vld [vmem:[#allocation13 + $0x20] sm:$0xff]  ;;  %v641_v13 = vld [vmem:[#allocation13 + $0xb0] sm:$0xff]  ;;  %v642_v14 = vld [vmem:[#allocation13 + $0xb8] sm:$0xff] }
 0x23f   :  { %1010 = vmatprep.subr.bf16.mxu0 %v1009_v12  ;;  %v624_v12 = vld [vmem:[#allocation13 + $0x28] sm:$0xff]  ;;  %v1049_v16 = vpack.c.bf16 %v642_v14, %v641_v13 }
 0x240   :  { %v1047_v15 = vpack.c.bf16 %v624_v12, %v623_v11  ;;  %v651_v61 = vld [vmem:[%s1501_s7 + $0x5] ss:$0 sm:$0xff] }
 0x242   :  { %1012 = vmatpush1.bf16.msra.mxu0 %v1011_v0  ;;  %v625_v0 = vld [vmem:[#allocation13 + $0x30] sm:$0xff] }
 0x243   :  { %1014 = vmatprep.subr.bf16.mxu0 %v1013_v17  ;;  %v626_v17 = vld [vmem:[#allocation13 + $0x38] sm:$0xff] }
 0x244   :  { %v1051_v23 = vpack.c.bf16 %v626_v17, %v625_v0 }
 0x246   :  { %1016 = vmatpush1.bf16.msra.mxu0 %v1015_v25  ;;  %v627_v25 = vld [vmem:[#allocation13 + $0x40] sm:$0xff] }
 0x247   :  { %1018 = vmatprep.subr.bf16.mxu0 %v1017_v26  ;;  %v628_v26 = vld [vmem:[#allocation13 + $0x48] sm:$0xff] }
 0x248   :  { %v1055_v29 = vpack.c.bf16 %v628_v26, %v627_v25 }
 0x24a   :  { %1020 = vmatpush1.bf16.msra.mxu0 %v1019_v31  ;;  %v629_v31 = vld [vmem:[#allocation13 + $0x50] sm:$0xff] }
 0x24b   :  { %1022 = vmatprep.subr.bf16.mxu0 %v1021_v32  ;;  %v630_v32 = vld [vmem:[#allocation13 + $0x58] sm:$0xff] }
 0x24c   :  { %v1059_v35 = vpack.c.bf16 %v630_v32, %v629_v31 }
 0x24e   :  { %1024 = vmatpush1.bf16.msra.mxu0 %v1023_v37  ;;  %v429_v37 = vld [vmem:[%s1501_s7 + $0x3] ss:$0 sm:$0xff] }
 0x24f   :  { %1026 = vmatprep.subr.bf16.mxu0 %v1025_v38 }
 0x252   :  { %1028 = vmatpush1.bf16.msra.mxu0 %v1027_v43  ;;  %v632_v43 = vld [vmem:[#allocation13 + $0x68] sm:$0xff] }
 0x253   :  { %1030 = vmatprep.subr.bf16.mxu0 %v1029_v44  ;;  %v1063_v44 = vpack.c.bf16 %v632_v43, %v631_v42 }
 0x256   :  { %1032 = vmatpush1.bf16.msra.mxu0 %v1031_v47  ;;  %v1065_v47 = vpack.c.bf16 %v650_v46, %v649_v45 }
 0x257   :  { %1034 = vmatprep.subr.bf16.mxu0 %v1033_v55 }
 0x25a   :  { %1036 = vmatpush1.bf16.msra.mxu0 %v1035_v58 }
 0x310   :  { %v408_v49 = vpop.f32.mrb[2].mxu0 }
 0x311   :  { %v409_v50 = vadd.f32 %v408_v49, %v341_v48  ;;  %v881_v51 = vpop.f32.mrb[3].mxu0  ;;  %v633_v48 = vld [vmem:[#allocation13 + $0x70] sm:$0xff]  ;;  %v634_v49 = vld [vmem:[#allocation13 + $0x78] sm:$0xff] }
 0x312   :  { %v742_v51 = vld [vmem:[%s1501_s7 + $0x4] ss:$8 sm:$0x3] }
 0x313   :  { %v412_v52 = vmax.f32 %v409_v50, 0.0  ;;  %v1067_v50 = vpack.c.bf16 %v634_v49, %v633_v48  ;;  %v543_v53 = vrot.slane %v742_v51, %v140_v22 }
 0x315   :  { %915 = vmatmul.mubr.f32.vlgmr.msra.gmra.mrb[2].mxu1 %v412_v52  ;;  %v539_v52 = vrot.slane %v742_v51, %v136_v20 }
 0x316   :  { %1040 = vmatpush3.bf16.msra.mxu1 %v1039_v4 }
 0x317   :  { %1042 = vmatprep.subr.bf16.mxu1 %v1041_v5 }
 0x31a   :  { %1044 = vmatpush3.bf16.msra.mxu1 %v1043_v9 }
 0x31b   :  { %1046 = vmatprep.subr.bf16.mxu1 %v1045_v10 }
 0x31e   :  { %1048 = vmatpush3.bf16.msra.mxu1 %v1047_v15 }
 0x31f   :  { %1050 = vmatprep.subr.bf16.mxu1 %v1049_v16 }
 0x322   :  { %1052 = vmatpush3.bf16.msra.mxu1 %v1051_v23 }
 0x323   :  { %1054 = vmatprep.subr.bf16.mxu1 %v1053_v24 }
 0x326   :  { %1056 = vmatpush3.bf16.msra.mxu1 %v1055_v29 }
 0x327   :  { %1058 = vmatprep.subr.bf16.mxu1 %v1057_v30 }
 0x32a   :  { %1060 = vmatpush3.bf16.msra.mxu1 %v1059_v35 }
 0x32b   :  { %1062 = vmatprep.subr.bf16.mxu1 %v1061_v36 }
 0x32e   :  { %1064 = vmatpush3.bf16.msra.mxu1 %v1063_v44 }
 0x32f   :  { %1066 = vmatprep.subr.bf16.mxu1 %v1065_v47 }
 0x332   :  { %1068 = vmatpush3.bf16.msra.mxu1 %v1067_v50 }
 0x3e8   :  { %v496_v38 = vpop.f32.mrb[2].mxu1 }
 0x3e9   :  { %v497_v39 = vadd.f32 %v496_v38, %v429_v37  ;;  %v916_v40 = vpop.f32.mrb[3].mxu1 }
 0x3eb   :  { %v500_v41 = vmax.f32 %v497_v39, 0.0 }
 0x3ed   :  { %611 = vmatmul.mubr.f32.vlgmr.msra.gmra.mrb[4].mxu0 %v500_v41 }
 0x4c0   :  { %v612_v54 = vpop.f32.mrb[4].mxu0 }
 0x4c1   :  { %v613_v55 = vadd.f32 %v612_v54, %v539_v52  ;;  %v614_v56 = vpop.f32.mrb[5].mxu0 }
 0x4c2   :  { %v615_v57 = vadd.f32 %v614_v56, %v543_v53 }
 0x4c3   :  { %v617_v59 = vmax.f32 %v613_v55, 0.0 }
 0x4c4   :  { %v618_v58 = vmax.f32 %v615_v57, 0.0 }
 0x4c6   :  { %716 = vmatprep.mubr.f32.mxu1 %v618_v58 }
 0x4c7   :  { %717 = vmatmul.mubr.f32.vlgmr.msra.gmra.mrb[4].mxu1 %v617_v59 }
 0x59a   :  { %v844_v60 = vpop.f32.mrb[4].mxu1 }
 0x59b   :  { %v845_v62 = vpop.f32.mrb[5].mxu1 }
 0x59c   :  { %v846_v20 = vadd.f32 %v845_v62, %v844_v60 }
 0x59e   :  { %v719_v63 = vadd.f32 %v846_v20, %v651_v61 }
 0x5a0   :  { %722 = vst [vmem:[#allocation14] sm:$0xff] %v719_v63 }
 0x5a1   :  { %1249 = shalt.err (!%p1246_p4)
}
 0x5a2   :  { %s1250_s27 = scalar_lea.hbm %s1502_s8, 128 }
 0x5a3   :  { %p1251_p5 = scmp.ne.s32.totalorder %s1502_s8, %s1250_s27  ;;  %p1254_p6 = scmp.lt.u32.totalorder %s1250_s27, %s1502_s8 }
 0x5a5   :  { %p1256_p7 = pnand %p1254_p6, %p1251_p5 }
 0x5a7   :  { %1259 = shalt.err (!%p1256_p7)
}
 0x5a8   :  { %732 = dma.vmem_to_hbm [thread:$0]  %s730_s12, 128, %s1502_s8, [#allocation4]  }
 0x5a9   :  { %1268 = dma.done.wait [#allocation4], 128  }
 0x5aa   :  { %1269 = vsyncadd [#allocation4], 4294967168 }
 0x5ab   :  { %736 = vsyncpa [#allocation3], 1 }
 0x5ac   :  { %737 = vsyncpa [#allocation6], 1 }
 0x5ad   :  { %738 = vsyncpa [#allocation9], 1 }
 0x5ae   :  { %739 = vsyncpa [#allocation12], 1 }
 0x5af   :  { %740 = vsyncpa [#allocation4], 1 }

</bundles_post_ra>
